<compile_context>
chip_gen: v5e
topology: v5e:2x2
jax: 0.10.0
libtpu: 0.0.40
codegen_flags: <defaults>
</compile_context>

<pallas_src>
import functools
import math

import jax
import jax.numpy as jnp
from jax.experimental import pallas as pl
from jax.experimental.pallas import tpu as pltpu

SELU_ALPHA = 1.6732632423543772
SELU_SCALE = 1.0507009873554805


def _selu(x):
    return SELU_SCALE * jnp.where(x > 0, x, SELU_ALPHA * (jnp.exp(x) - 1.0))


def graph_gather_kernel(hid_ref, inp_ref, mask_ref,
                        aw0h_ref, aw0x_ref, aw1_ref, aw2_ref,
                        ew0_ref, ew1_ref, ew2_ref,
                        out_ref, *, bt, n):
    f = hid_ref.shape[-1]
    rows = bt * n
    wdt = aw1_ref.dtype  # matmul compute dtype (f32 or bf16)

    h = hid_ref[...].reshape(rows, f)        # (rows, F)
    x = inp_ref[...].reshape(rows, f)        # (rows, F)

    # --- attention FFN on cat([hidden, input], -1) ---
    # cat @ W0 == h @ W0[:F] + x @ W0[F:]  (W0 pre-split in the wrapper).
    a = (jnp.dot(h, aw0h_ref[...], preferred_element_type=jnp.float32)
         + jnp.dot(x, aw0x_ref[...], preferred_element_type=jnp.float32))
    a = _selu(a)
    a = _selu(jnp.dot(a.astype(wdt), aw1_ref[...],
                      preferred_element_type=jnp.float32))
    energies = jnp.dot(a.astype(wdt), aw2_ref[...],
                       preferred_element_type=jnp.float32)         # (rows, O)

    # --- embedding FFN on hidden nodes ---
    e = _selu(jnp.dot(h, ew0_ref[...], preferred_element_type=jnp.float32))
    e = _selu(jnp.dot(e.astype(wdt), ew1_ref[...],
                      preferred_element_type=jnp.float32))
    embedding = jnp.dot(e.astype(wdt), ew2_ref[...],
                        preferred_element_type=jnp.float32)        # (rows, O)

    o = energies.shape[-1]
    energies = energies.reshape(bt, n, o)
    embedding = embedding.reshape(bt, n, o)

    # Masked attention: padded nodes (mask == 0) get attention exactly 0
    # (equivalent to sigmoid(energies - 1e6) == 0 in f32).
    valid = (mask_ref[...] != 0.0).astype(jnp.float32)             # (bt, n, 1)
    attention = jax.nn.sigmoid(energies) * valid                   # (bt, n, O)

    # Gather: sum over nodes; write a full (bt, O) lane/row-dense slab.
    out_ref[...] = jnp.sum(attention * embedding, axis=1)          # (bt, O)


def graph_gather(hidden_nodes, input_nodes, node_mask, params,
                 *, compute_dtype=jnp.float32, batch_tile=None):
    B, N, F = hidden_nodes.shape
    aw0, aw1, aw2, ew0, ew1, ew2 = params
    O = aw2.shape[1]

    # Pre-split the first attention weight in the wrapper (free; no in-kernel
    # ref slicing).
    aw0_h, aw0_x = aw0[:F, :], aw0[F:, :]

    cd = compute_dtype
    hid = hidden_nodes.astype(cd)
    inp = input_nodes.astype(cd)
    weights = [w.astype(cd) for w in (aw0_h, aw0_x, aw1, aw2, ew0, ew1, ew2)]
    mask3 = node_mask.reshape(B, N, 1).astype(jnp.float32)

    # Batch tiling: target ~512 matmul rows per grid step.
    if batch_tile is None:
        bt = max(1, min(B, pl.cdiv(512, N)))
        if bt < B and bt % 8 != 0:
            bt = min(B, ((bt + 7) // 8) * 8)   # keep output block 8-aligned
    else:
        bt = int(batch_tile)

    Bp = pl.cdiv(B, bt) * bt
    if Bp != B:
        pad = Bp - B
        hid = jnp.pad(hid, ((0, pad), (0, 0), (0, 0)))
        inp = jnp.pad(inp, ((0, pad), (0, 0), (0, 0)))
        mask3 = jnp.pad(mask3, ((0, pad), (0, 0), (0, 0)))

    def w_spec(w):
        return pl.BlockSpec(w.shape, lambda b: (0, 0))

    kernel = functools.partial(graph_gather_kernel, bt=bt, n=N)

    out = pl.pallas_call(
        kernel,
        out_shape=jax.ShapeDtypeStruct((Bp, O), jnp.float32),
        grid_spec=pltpu.PrefetchScalarGridSpec(
            num_scalar_prefetch=0,
            grid=(Bp // bt,),
            in_specs=[
                pl.BlockSpec((bt, N, F), lambda b: (b, 0, 0)),   # hidden_nodes
                pl.BlockSpec((bt, N, F), lambda b: (b, 0, 0)),   # input_nodes
                pl.BlockSpec((bt, N, 1), lambda b: (b, 0, 0)),   # node_mask
            ] + [w_spec(w) for w in weights],
            out_specs=pl.BlockSpec((bt, O), lambda b: (b, 0)),
        ),
        compiler_params=pltpu.CompilerParams(
            dimension_semantics=("parallel",)),
    )(hid, inp, mask3, *weights)
    return out[:B]


def graph_gather_ref(hidden_nodes, input_nodes, node_mask, params):
    # Pure-JAX reference matching the PyTorch forward exactly (f32).
    aw0, aw1, aw2, ew0, ew1, ew2 = params
    cat = jnp.concatenate([hidden_nodes, input_nodes], axis=2)
    a = _selu(cat @ aw0)
    a = _selu(a @ aw1)
    energies = a @ aw2
    energy_mask = (node_mask == 0).astype(jnp.float32) * 1000000.0
    attention = jax.nn.sigmoid(energies - energy_mask[..., None])
    e = _selu(hidden_nodes @ ew0)
    e = _selu(e @ ew1)
    embedding = e @ ew2
    return jnp.sum(attention * embedding, axis=1)


def init_params(key, node_features, att_hidden, emb_hidden, out_features):
    # PyTorch init: normal(std=sqrt(1/in_features)), no bias; stored as [in, out].
    def w(k, fan_in, fan_out):
        return (jax.random.normal(k, (fan_in, fan_out), jnp.float32)
                * math.sqrt(1.0 / fan_in))
    ks = jax.random.split(key, 6)
    aw0 = w(ks[0], node_features * 2, att_hidden)
    aw1 = w(ks[1], att_hidden, att_hidden)
    aw2 = w(ks[2], att_hidden, out_features)
    ew0 = w(ks[3], node_features, emb_hidden)
    ew1 = w(ks[4], emb_hidden, emb_hidden)
    ew2 = w(ks[5], emb_hidden, out_features)
    return (aw0, aw1, aw2, ew0, ew1, ew2)


if __name__ == "__main__":
    B, N, F = 2, 8, 32            # batch, nodes, node_features
    H_ATT, H_EMB, O = 64, 64, 32  # att/emb hidden dims (depth=2), out_features

    key = jax.random.PRNGKey(0)
    k_h, k_x, k_m, k_p = jax.random.split(key, 4)

    hidden_nodes = jax.random.normal(k_h, (B, N, F), jnp.float32)
    input_nodes = jax.random.normal(k_x, (B, N, F), jnp.float32)
    # 0/1 node mask with some padded (zero) nodes
    node_mask = (jax.random.uniform(k_m, (B, N)) > 0.3).astype(jnp.float32)

    params = init_params(k_p, F, H_ATT, H_EMB, O)
    ref = graph_gather_ref(hidden_nodes, input_nodes, node_mask, params)

    # f32 matmul path: tight check vs. the PyTorch-equivalent reference.
    out = graph_gather(hidden_nodes, input_nodes, node_mask, params,
                       compute_dtype=jnp.float32)
    out = jax.block_until_ready(out)
    assert out.shape == (B, O)
    assert jnp.allclose(out, ref, atol=1e-4, rtol=1e-4), "f32 mismatch vs reference"

    # bf16 matmul path (MXU fast path on v6e/v7x): looser tolerance.
    out_bf16 = graph_gather(hidden_nodes, input_nodes, node_mask, params,
                            compute_dtype=jnp.bfloat16)
    out_bf16 = jax.block_until_ready(out_bf16)
    assert jnp.allclose(out_bf16, ref, atol=2e-1, rtol=1e-1), "bf16 mismatch vs reference"

    print("KERNEL_OK")
</pallas_src>

<mosaic_0001>
module attributes {stable_mosaic.version = 11 : i64} {
  func.func @graph_gather_kernel(%arg0: i32, %arg1: memref<2x8x32xf32, #tpu.memory_space<vmem>>, %arg2: memref<2x8x32xf32, #tpu.memory_space<vmem>>, %arg3: memref<2x8x1xf32, #tpu.memory_space<vmem>>, %arg4: memref<32x64xf32, #tpu.memory_space<vmem>>, %arg5: memref<32x64xf32, #tpu.memory_space<vmem>>, %arg6: memref<64x64xf32, #tpu.memory_space<vmem>>, %arg7: memref<64x32xf32, #tpu.memory_space<vmem>>, %arg8: memref<32x64xf32, #tpu.memory_space<vmem>>, %arg9: memref<64x64xf32, #tpu.memory_space<vmem>>, %arg10: memref<64x32xf32, #tpu.memory_space<vmem>>, %arg11: memref<2x32xf32, #tpu.memory_space<vmem>>) attributes {dimension_semantics = [#tpu.dimension_semantics<parallel>], iteration_bounds = array<i64: 1>, scalar_prefetch = 0 : i64, scratch_operands = 0 : i64, tpu.core_type = #tpu.core_type<tc>, window_params = [{transform_indices = @transform_0, window_bounds = array<i64: 2, 8, 32>}, {transform_indices = @transform_1, window_bounds = array<i64: 2, 8, 32>}, {transform_indices = @transform_2, window_bounds = array<i64: 2, 8, 1>}, {pipeline_mode = #tpu.pipeline_mode<synchronous>, transform_indices = @transform_3, window_bounds = array<i64: 32, 64>}, {pipeline_mode = #tpu.pipeline_mode<synchronous>, transform_indices = @transform_4, window_bounds = array<i64: 32, 64>}, {pipeline_mode = #tpu.pipeline_mode<synchronous>, transform_indices = @transform_5, window_bounds = array<i64: 64, 64>}, {pipeline_mode = #tpu.pipeline_mode<synchronous>, transform_indices = @transform_6, window_bounds = array<i64: 64, 32>}, {pipeline_mode = #tpu.pipeline_mode<synchronous>, transform_indices = @transform_7, window_bounds = array<i64: 32, 64>}, {pipeline_mode = #tpu.pipeline_mode<synchronous>, transform_indices = @transform_8, window_bounds = array<i64: 64, 64>}, {pipeline_mode = #tpu.pipeline_mode<synchronous>, transform_indices = @transform_9, window_bounds = array<i64: 64, 32>}, {transform_indices = @transform_10, window_bounds = array<i64: 2, 32>}]} {
    %c0 = arith.constant 0 : index
    %c0_0 = arith.constant 0 : index
    %c0_1 = arith.constant 0 : index
    %0 = vector.load %arg1[%c0, %c0_0, %c0_1] : memref<2x8x32xf32, #tpu.memory_space<vmem>>, vector<2x8x32xf32>
    %1 = vector.shape_cast %0 : vector<2x8x32xf32> to vector<16x32xf32>
    %c0_2 = arith.constant 0 : index
    %c0_3 = arith.constant 0 : index
    %c0_4 = arith.constant 0 : index
    %2 = vector.load %arg2[%c0_2, %c0_3, %c0_4] : memref<2x8x32xf32, #tpu.memory_space<vmem>>, vector<2x8x32xf32>
    %3 = vector.shape_cast %2 : vector<2x8x32xf32> to vector<16x32xf32>
    %c0_5 = arith.constant 0 : index
    %c0_6 = arith.constant 0 : index
    %4 = vector.load %arg4[%c0_5, %c0_6] : memref<32x64xf32, #tpu.memory_space<vmem>>, vector<32x64xf32>
    %cst = arith.constant dense<0.000000e+00> : vector<16x64xf32>
    %5 = tpu.matmul %1, %4, %cst {dimension_numbers = #tpu.dot_dimension_numbers<[1], [0], [0], [1], [0, 0, 1, 1], [], []>} : vector<16x32xf32>, vector<32x64xf32>, vector<16x64xf32> -> vector<16x64xf32>
    %c0_7 = arith.constant 0 : index
    %c0_8 = arith.constant 0 : index
    %6 = vector.load %arg5[%c0_7, %c0_8] : memref<32x64xf32, #tpu.memory_space<vmem>>, vector<32x64xf32>
    %cst_9 = arith.constant dense<0.000000e+00> : vector<16x64xf32>
    %7 = tpu.matmul %3, %6, %cst_9 {dimension_numbers = #tpu.dot_dimension_numbers<[1], [0], [0], [1], [0, 0, 1, 1], [], []>} : vector<16x32xf32>, vector<32x64xf32>, vector<16x64xf32> -> vector<16x64xf32>
    %8 = arith.addf %5, %7 : vector<16x64xf32>
    %cst_10 = arith.constant 0.000000e+00 : f32
    %9 = vector.broadcast %cst_10 : f32 to vector<16x64xf32>
    %10 = arith.cmpf ogt, %8, %9 : vector<16x64xf32>
    %11 = math.exp %8 : vector<16x64xf32>
    %cst_11 = arith.constant 1.000000e+00 : f32
    %12 = vector.broadcast %cst_11 : f32 to vector<16x64xf32>
    %13 = arith.subf %11, %12 : vector<16x64xf32>
    %cst_12 = arith.constant 1.67326319 : f32
    %14 = vector.broadcast %cst_12 : f32 to vector<16x64xf32>
    %15 = arith.mulf %14, %13 : vector<16x64xf32>
    %16 = arith.select %10, %8, %15 : vector<16x64xi1>, vector<16x64xf32>
    %cst_13 = arith.constant 1.05070102 : f32
    %17 = vector.broadcast %cst_13 : f32 to vector<16x64xf32>
    %18 = arith.mulf %17, %16 : vector<16x64xf32>
    %c0_14 = arith.constant 0 : index
    %c0_15 = arith.constant 0 : index
    %19 = vector.load %arg6[%c0_14, %c0_15] : memref<64x64xf32, #tpu.memory_space<vmem>>, vector<64x64xf32>
    %cst_16 = arith.constant dense<0.000000e+00> : vector<16x64xf32>
    %20 = tpu.matmul %18, %19, %cst_16 {dimension_numbers = #tpu.dot_dimension_numbers<[1], [0], [0], [1], [0, 0, 1, 1], [], []>} : vector<16x64xf32>, vector<64x64xf32>, vector<16x64xf32> -> vector<16x64xf32>
    %cst_17 = arith.constant 0.000000e+00 : f32
    %21 = vector.broadcast %cst_17 : f32 to vector<16x64xf32>
    %22 = arith.cmpf ogt, %20, %21 : vector<16x64xf32>
    %23 = math.exp %20 : vector<16x64xf32>
    %cst_18 = arith.constant 1.000000e+00 : f32
    %24 = vector.broadcast %cst_18 : f32 to vector<16x64xf32>
    %25 = arith.subf %23, %24 : vector<16x64xf32>
    %cst_19 = arith.constant 1.67326319 : f32
    %26 = vector.broadcast %cst_19 : f32 to vector<16x64xf32>
    %27 = arith.mulf %26, %25 : vector<16x64xf32>
    %28 = arith.select %22, %20, %27 : vector<16x64xi1>, vector<16x64xf32>
    %cst_20 = arith.constant 1.05070102 : f32
    %29 = vector.broadcast %cst_20 : f32 to vector<16x64xf32>
    %30 = arith.mulf %29, %28 : vector<16x64xf32>
    %c0_21 = arith.constant 0 : index
    %c0_22 = arith.constant 0 : index
    %31 = vector.load %arg7[%c0_21, %c0_22] : memref<64x32xf32, #tpu.memory_space<vmem>>, vector<64x32xf32>
    %cst_23 = arith.constant dense<0.000000e+00> : vector<16x32xf32>
    %32 = tpu.matmul %30, %31, %cst_23 {dimension_numbers = #tpu.dot_dimension_numbers<[1], [0], [0], [1], [0, 0, 1, 1], [], []>} : vector<16x64xf32>, vector<64x32xf32>, vector<16x32xf32> -> vector<16x32xf32>
    %c0_24 = arith.constant 0 : index
    %c0_25 = arith.constant 0 : index
    %33 = vector.load %arg8[%c0_24, %c0_25] : memref<32x64xf32, #tpu.memory_space<vmem>>, vector<32x64xf32>
    %cst_26 = arith.constant dense<0.000000e+00> : vector<16x64xf32>
    %34 = tpu.matmul %1, %33, %cst_26 {dimension_numbers = #tpu.dot_dimension_numbers<[1], [0], [0], [1], [0, 0, 1, 1], [], []>} : vector<16x32xf32>, vector<32x64xf32>, vector<16x64xf32> -> vector<16x64xf32>
    %cst_27 = arith.constant 0.000000e+00 : f32
    %35 = vector.broadcast %cst_27 : f32 to vector<16x64xf32>
    %36 = arith.cmpf ogt, %34, %35 : vector<16x64xf32>
    %37 = math.exp %34 : vector<16x64xf32>
    %cst_28 = arith.constant 1.000000e+00 : f32
    %38 = vector.broadcast %cst_28 : f32 to vector<16x64xf32>
    %39 = arith.subf %37, %38 : vector<16x64xf32>
    %cst_29 = arith.constant 1.67326319 : f32
    %40 = vector.broadcast %cst_29 : f32 to vector<16x64xf32>
    %41 = arith.mulf %40, %39 : vector<16x64xf32>
    %42 = arith.select %36, %34, %41 : vector<16x64xi1>, vector<16x64xf32>
    %cst_30 = arith.constant 1.05070102 : f32
    %43 = vector.broadcast %cst_30 : f32 to vector<16x64xf32>
    %44 = arith.mulf %43, %42 : vector<16x64xf32>
    %c0_31 = arith.constant 0 : index
    %c0_32 = arith.constant 0 : index
    %45 = vector.load %arg9[%c0_31, %c0_32] : memref<64x64xf32, #tpu.memory_space<vmem>>, vector<64x64xf32>
    %cst_33 = arith.constant dense<0.000000e+00> : vector<16x64xf32>
    %46 = tpu.matmul %44, %45, %cst_33 {dimension_numbers = #tpu.dot_dimension_numbers<[1], [0], [0], [1], [0, 0, 1, 1], [], []>} : vector<16x64xf32>, vector<64x64xf32>, vector<16x64xf32> -> vector<16x64xf32>
    %cst_34 = arith.constant 0.000000e+00 : f32
    %47 = vector.broadcast %cst_34 : f32 to vector<16x64xf32>
    %48 = arith.cmpf ogt, %46, %47 : vector<16x64xf32>
    %49 = math.exp %46 : vector<16x64xf32>
    %cst_35 = arith.constant 1.000000e+00 : f32
    %50 = vector.broadcast %cst_35 : f32 to vector<16x64xf32>
    %51 = arith.subf %49, %50 : vector<16x64xf32>
    %cst_36 = arith.constant 1.67326319 : f32
    %52 = vector.broadcast %cst_36 : f32 to vector<16x64xf32>
    %53 = arith.mulf %52, %51 : vector<16x64xf32>
    %54 = arith.select %48, %46, %53 : vector<16x64xi1>, vector<16x64xf32>
    %cst_37 = arith.constant 1.05070102 : f32
    %55 = vector.broadcast %cst_37 : f32 to vector<16x64xf32>
    %56 = arith.mulf %55, %54 : vector<16x64xf32>
    %c0_38 = arith.constant 0 : index
    %c0_39 = arith.constant 0 : index
    %57 = vector.load %arg10[%c0_38, %c0_39] : memref<64x32xf32, #tpu.memory_space<vmem>>, vector<64x32xf32>
    %cst_40 = arith.constant dense<0.000000e+00> : vector<16x32xf32>
    %58 = tpu.matmul %56, %57, %cst_40 {dimension_numbers = #tpu.dot_dimension_numbers<[1], [0], [0], [1], [0, 0, 1, 1], [], []>} : vector<16x64xf32>, vector<64x32xf32>, vector<16x32xf32> -> vector<16x32xf32>
    %59 = vector.shape_cast %32 : vector<16x32xf32> to vector<2x8x32xf32>
    %60 = vector.shape_cast %58 : vector<16x32xf32> to vector<2x8x32xf32>
    %c0_41 = arith.constant 0 : index
    %c0_42 = arith.constant 0 : index
    %c0_43 = arith.constant 0 : index
    %61 = vector.load %arg3[%c0_41, %c0_42, %c0_43] : memref<2x8x1xf32, #tpu.memory_space<vmem>>, vector<2x8x1xf32>
    %cst_44 = arith.constant 0.000000e+00 : f32
    %62 = vector.broadcast %cst_44 : f32 to vector<2x8x1xf32>
    %63 = arith.cmpf one, %61, %62 : vector<2x8x1xf32>
    %64 = arith.extui %63 : vector<2x8x1xi1> to vector<2x8x1xi32>
    %65 = arith.sitofp %64 : vector<2x8x1xi32> to vector<2x8x1xf32>
    %66 = arith.negf %59 : vector<2x8x32xf32>
    %67 = math.exp %66 : vector<2x8x32xf32>
    %cst_45 = arith.constant 1.000000e+00 : f32
    %68 = vector.broadcast %cst_45 : f32 to vector<2x8x32xf32>
    %69 = arith.addf %68, %67 : vector<2x8x32xf32>
    %70 = arith.divf %68, %69 : vector<2x8x32xf32>
    %71 = vector.broadcast %65 : vector<2x8x1xf32> to vector<2x8x32xf32>
    %72 = arith.mulf %70, %71 : vector<2x8x32xf32>
    %73 = arith.mulf %72, %60 : vector<2x8x32xf32>
    %cst_46 = arith.constant dense<0.000000e+00> : vector<2x32xf32>
    %74 = vector.multi_reduction <add>, %73, %cst_46 [1] : vector<2x8x32xf32> to vector<2x32xf32>
    %c0_47 = arith.constant 0 : index
    %c0_48 = arith.constant 0 : index
    %75 = vector.load %arg11[%c0_47, %c0_48] : memref<2x32xf32, #tpu.memory_space<vmem>>, vector<2x32xf32>
    tpu.vector_store %arg11[%c0_47, %c0_48], %74 {strides = array<i32>} : memref<2x32xf32, #tpu.memory_space<vmem>>, vector<2x32xf32>,
    return
  }
  func.func @transform_0(%arg0: i32) -> (i32, i32, i32) {
    %c0_i32 = arith.constant 0 : i32
    %c0_i32_0 = arith.constant 0 : i32
    %c0_i32_1 = arith.constant 0 : i32
    return %arg0, %c0_i32, %c0_i32_0 : i32, i32, i32
  }
  func.func @transform_1(%arg0: i32) -> (i32, i32, i32) {
    %c0_i32 = arith.constant 0 : i32
    %c0_i32_0 = arith.constant 0 : i32
    %c0_i32_1 = arith.constant 0 : i32
    return %arg0, %c0_i32, %c0_i32_0 : i32, i32, i32
  }
  func.func @transform_2(%arg0: i32) -> (i32, i32, i32) {
    %c0_i32 = arith.constant 0 : i32
    %c0_i32_0 = arith.constant 0 : i32
    %c0_i32_1 = arith.constant 0 : i32
    return %arg0, %c0_i32, %c0_i32_0 : i32, i32, i32
  }
  func.func @transform_3(%arg0: i32) -> (i32, i32) {
    %c0_i32 = arith.constant 0 : i32
    %c0_i32_0 = arith.constant 0 : i32
    %c0_i32_1 = arith.constant 0 : i32
    return %c0_i32, %c0_i32_0 : i32, i32
  }
  func.func @transform_4(%arg0: i32) -> (i32, i32) {
    %c0_i32 = arith.constant 0 : i32
    %c0_i32_0 = arith.constant 0 : i32
    %c0_i32_1 = arith.constant 0 : i32
    return %c0_i32, %c0_i32_0 : i32, i32
  }
  func.func @transform_5(%arg0: i32) -> (i32, i32) {
    %c0_i32 = arith.constant 0 : i32
    %c0_i32_0 = arith.constant 0 : i32
    %c0_i32_1 = arith.constant 0 : i32
    return %c0_i32, %c0_i32_0 : i32, i32
  }
  func.func @transform_6(%arg0: i32) -> (i32, i32) {
    %c0_i32 = arith.constant 0 : i32
    %c0_i32_0 = arith.constant 0 : i32
    %c0_i32_1 = arith.constant 0 : i32
    return %c0_i32, %c0_i32_0 : i32, i32
  }
  func.func @transform_7(%arg0: i32) -> (i32, i32) {
    %c0_i32 = arith.constant 0 : i32
    %c0_i32_0 = arith.constant 0 : i32
    %c0_i32_1 = arith.constant 0 : i32
    return %c0_i32, %c0_i32_0 : i32, i32
  }
  func.func @transform_8(%arg0: i32) -> (i32, i32) {
    %c0_i32 = arith.constant 0 : i32
    %c0_i32_0 = arith.constant 0 : i32
    %c0_i32_1 = arith.constant 0 : i32
    return %c0_i32, %c0_i32_0 : i32, i32
  }
  func.func @transform_9(%arg0: i32) -> (i32, i32) {
    %c0_i32 = arith.constant 0 : i32
    %c0_i32_0 = arith.constant 0 : i32
    %c0_i32_1 = arith.constant 0 : i32
    return %c0_i32, %c0_i32_0 : i32, i32
  }
  func.func @transform_10(%arg0: i32) -> (i32, i32) {
    %c0_i32 = arith.constant 0 : i32
    %c0_i32_0 = arith.constant 0 : i32
    return %arg0, %c0_i32 : i32, i32
  }
}

</mosaic_0001>

<bundles_post_ra>
// kernel: tpu_custom_call.1
= control target key start
LH: loop header
LB: loop body
LE: loop exit
PB: predicated region body
PF: predicated region fallthrough
CT: control target
= control target key end

     0   :  { %15 = vsyncpa [#allocation3], 0  ;;  %s870_s0 = inlined_call_operand.vmem [shape: f32[2,8,32], index: 0, kind: input, shape index: {}]   ;;  %s871_s1 = inlined_call_operand.hbm [shape: f32[2,8,32], index: 1, kind: input, shape index: {}]   ;;  %s872_s2 = inlined_call_operand.vmem [shape: f32[2,8,1], index: 2, kind: input, shape index: {}]   ;;  %s873_s3 = inlined_call_operand.vmem [shape: f32[32,64], index: 3, kind: input, shape index: {}]   ;;  %s874_s4 = inlined_call_operand.hbm [shape: f32[32,64], index: 4, kind: input, shape index: {}]   ;;  %s875_s5 = inlined_call_operand.vmem [shape: f32[64,64], index: 5, kind: input, shape index: {}]   ;;  %s876_s6 = inlined_call_operand.vmem [shape: f32[64,32], index: 6, kind: input, shape index: {}]   ;;  %s877_s7 = inlined_call_operand.hbm [shape: f32[32,64], index: 7, kind: input, shape index: {}]   ;;  %s878_s8 = inlined_call_operand.vmem [shape: f32[64,64], index: 8, kind: input, shape index: {}]   ;;  %s879_s9 = inlined_call_operand.vmem [shape: f32[64,32], index: 9, kind: input, shape index: {}]   ;;  %s880_s10 = inlined_call_operand.hbm [shape: f32[2,32], index: 10, kind: output, shape index: {}]  }
   0x1   :  { %16 = vsyncpa [#allocation6], 0 }
   0x2   :  { %17 = vsyncpa [#allocation4], 0  ;;  %s41_s15 = sshll.u32 %s874_s4, 4  ;;  %s659_s16 = smov [#allocation5]   ;;  %s42_s15 = int_to_ptr.hbm [resolvable:$true] %s41_s15 }
   0x3   :  { %s43_s17 = sshll.u32 %s659_s16, 4  ;;  %s24_s20 = sshll.u32 %s871_s1, 4  ;;  %s44_s17 = int_to_ptr.vmem [resolvable:$true] %s43_s17  ;;  %s25_s20 = int_to_ptr.hbm [resolvable:$true] %s24_s20 }
   0x4   :  { %s660_s21 = smov 128   ;;  %s661_s22 = smov 8  }
   0x5   :  { %49 = dma.hbm_to_vmem [thread:$0]  %s42_s15, 512, %s44_s17, [#allocation6], %s660_s21, %s660_s21, %s661_s22  }
   0x6   :  { %s662_s23 = smov [#allocation2]   ;;  %s58_s27 = sshll.u32 %s877_s7, 4  ;;  %s59_s27 = int_to_ptr.hbm [resolvable:$true] %s58_s27 }
   0x7   :  { %s26_s24 = sshll.u32 %s662_s23, 4  ;;  %s663_s4 = smov [#allocation7]   ;;  %s27_s24 = int_to_ptr.vmem [resolvable:$true] %s26_s24 }
   0x8   :  { %32 = dma.hbm_to_vmem [thread:$0]  %s25_s20, 256, %s27_s24, [#allocation3], %s660_s21, %s660_s21, %s661_s22  }
   0x9   :  { %s60_s28 = sshll.u32 %s663_s4, 4  ;;  %s61_s28 = int_to_ptr.vmem [resolvable:$true] %s60_s28 }
   0xa   :  { %66 = dma.hbm_to_vmem [thread:$0]  %s59_s27, 512, %s61_s28, [#allocation6], %s660_s21, %s660_s21, %s661_s22  }
   0xb   :  { %653 = dma.done.wait [#allocation3], 256  }
   0xc   :  { %654 = vsyncadd [#allocation3], 4294967040 }
   0xd   :  { %655 = dma.done.wait [#allocation6], 1024  }
   0xe   :  { %656 = vsyncadd [#allocation6], 4294966272  ;;  %v94_v0 = vld [vmem:[#allocation5 + $0x18] sm:$0xff]  ;;  %v90_v1 = vld [vmem:[%s873_s3 + $0x18] sm:$0xff]  ;;  %vm95_vm0 = vcmask 261120   ;;  %vm176_vm2 = vcmask 523264  }
   0xf   :  { %v93_v2 = vld [vmem:[#allocation5 + $0x10] sm:$0xff]  ;;  %114 = vmatpush.msra.mxu0 %v94_v0  ;;  %143 = vmatpush.msra.mxu1 %v90_v1  ;;  %v89_v3 = vld [vmem:[%s873_s3 + $0x10] sm:$0xff]  ;;  %v92_v4 = vld [vmem:[#allocation5 + $0x8] sm:$0xff]  ;;  %s474_s7 = sshll.u32 %s880_s10, 4  ;;  %s475_s7 = int_to_ptr.hbm [resolvable:$true] %s474_s7 }
  0x10   :  { %v88_v5 = vld [vmem:[%s873_s3 + $0x8] sm:$0xff]  ;;  %v91_v6 = vld [vmem:[#allocation5] sm:$0xff]  ;;  %v87_v7 = vld [vmem:[%s873_s3] sm:$0xff] }
  0x11   :  { %115 = vmatpush.msra.mxu0 %v93_v2  ;;  %144 = vmatpush.msra.mxu1 %v89_v3  ;;  %v85_v8 = vld [vmem:[#allocation2] sm:$0xff]  ;;  %v260_v10 = vld [vmem:[#allocation7 + $0x18] sm:$0xff]  ;;  %v258_v12 = vld [vmem:[#allocation7 + $0x8] sm:$0xff] }
  0x12   :  { %v83_v9 = vld [vmem:[%s870_s0] sm:$0xff]  ;;  %v257_v13 = vld [vmem:[#allocation7] sm:$0xff]  ;;  %v86_v14 = vld [vmem:[#allocation2 + $0x8] sm:$0xff] }
  0x13   :  { %116 = vmatpush.msra.mxu0 %v92_v4  ;;  %145 = vmatpush.msra.mxu1 %v88_v5  ;;  %v259_v11 = vld [vmem:[#allocation7 + $0x10] sm:$0xff]  ;;  %v84_v15 = vld [vmem:[%s870_s0 + $0x8] sm:$0xff]  ;;  %v175_v16 = vld [vmem:[%s875_s5 + $0x38] sm:$0xff] }
  0x14   :  { %191 = vmatpush.msra.mxu2 %v175_v16  ;;  %v174_v17 = vld [vmem:[%s875_s5 + $0x30] sm:$0xff]  ;;  %v173_v18 = vld [vmem:[%s875_s5 + $0x28] sm:$0xff]  ;;  %v172_v19 = vld [vmem:[%s875_s5 + $0x20] sm:$0xff] }
  0x15   :  { %117 = vmatpush.msra.mxu0 %v91_v6  ;;  %146 = vmatpush.msra.mxu1 %v87_v7  ;;  %v171_v20 = vld [vmem:[%s875_s5 + $0x18] sm:$0xff]  ;;  %v170_v21 = vld [vmem:[%s875_s5 + $0x10] sm:$0xff]  ;;  %v169_v22 = vld [vmem:[%s875_s5 + $0x8] sm:$0xff] }
  0x16   :  { %485 = vmatmul.msk.f32.vlgmr.msra.gmra.mxu0 %vm95_vm0, %v85_v8  ;;  %487 = vmatmul.msk.f32.vlgmr.msra.gmra.mxu1 %vm95_vm0, %v83_v9  ;;  %v168_v23 = vld [vmem:[%s875_s5] sm:$0xff]  ;;  %v305_v24 = vld [vmem:[%s878_s8 + $0x38] sm:$0xff]  ;;  %v304_v25 = vld [vmem:[%s878_s8 + $0x30] sm:$0xff] }
  0x17   :  { %273 = vmatpush.msrb.mxu0 %v260_v10  ;;  %192 = vmatpush.msra.mxu2 %v174_v17  ;;  %v303_v26 = vld [vmem:[%s878_s8 + $0x28] sm:$0xff]  ;;  %v302_v27 = vld [vmem:[%s878_s8 + $0x20] sm:$0xff]  ;;  %v301_v28 = vld [vmem:[%s878_s8 + $0x18] sm:$0xff] }
  0x18   :  { %320 = vmatpush.msrb.mxu1 %v305_v24  ;;  %v300_v29 = vld [vmem:[%s878_s8 + $0x10] sm:$0xff]  ;;  %v299_v30 = vld [vmem:[%s878_s8 + $0x8] sm:$0xff]  ;;  %v298_v31 = vld [vmem:[%s878_s8] sm:$0xff] }
  0x19   :  { %274 = vmatpush.msrb.mxu0 %v259_v11  ;;  %193 = vmatpush.msra.mxu2 %v173_v18  ;;  %v227_v0 = vld [vmem:[%s876_s6 + $0x38] sm:$0xff]  ;;  %v226_v1 = vld [vmem:[%s876_s6 + $0x30] sm:$0xff]  ;;  %v225_v2 = vld [vmem:[%s876_s6 + $0x28] sm:$0xff] }
  0x1a   :  { %321 = vmatpush.msrb.mxu1 %v304_v25  ;;  %242 = vmatpush.msra.mxu3 %v227_v0  ;;  %v224_v3 = vld [vmem:[%s876_s6 + $0x20] sm:$0xff]  ;;  %v223_v4 = vld [vmem:[%s876_s6 + $0x18] sm:$0xff]  ;;  %v222_v6 = vld [vmem:[%s876_s6 + $0x10] sm:$0xff] }
  0x1b   :  { %275 = vmatpush.msrb.mxu0 %v258_v12  ;;  %194 = vmatpush.msra.mxu2 %v172_v19  ;;  %v356_v5 = vld [vmem:[%s879_s9 + $0x38] sm:$0xff]  ;;  %v355_v7 = vld [vmem:[%s879_s9 + $0x30] sm:$0xff]  ;;  %v221_v8 = vld [vmem:[%s876_s6 + $0x8] sm:$0xff] }
  0x1c   :  { %322 = vmatpush.msrb.mxu1 %v303_v26  ;;  %243 = vmatpush.msra.mxu3 %v226_v1  ;;  %v220_v10 = vld [vmem:[%s876_s6] sm:$0xff]  ;;  %v352_v12 = vld [vmem:[%s879_s9 + $0x18] sm:$0xff]  ;;  %v387_v19 = vld [vmem:[%s872_s2 + $0x8] sm:$0xff] }
  0x1d   :  { %276 = vmatpush.msrb.mxu0 %v257_v13  ;;  %195 = vmatpush.msra.mxu2 %v171_v20  ;;  %v353_v11 = vld [vmem:[%s879_s9 + $0x20] sm:$0xff]  ;;  %v351_v13 = vld [vmem:[%s879_s9 + $0x10] sm:$0xff]  ;;  %v664_v20 = vmov 0   ;;  %vm389_vm7 = vcmp.ne.f32.partialorder %v387_v19, 0.0 }
  0x1e   :  { %486 = vmatmul.msk.f32.gmra.mxu0 %vm95_vm0, %v86_v14  ;;  %488 = vmatmul.msk.f32.gmra.mxu1 %vm95_vm0, %v84_v15  ;;  %v350_v14 = vld [vmem:[%s879_s9 + $0x8] sm:$0xff]  ;;  %v386_v18 = vld [vmem:[%s872_s2] sm:$0xff]  ;;  %s666_s2 = smov [#allocation8]  }
  0x1f   :  { %196 = vmatpush.msra.mxu2 %v170_v21  ;;  %323 = vmatpush.msrb.mxu1 %v302_v27  ;;  %vm388_vm6 = vcmp.ne.f32.partialorder %v386_v18, 0.0  ;;  %v665_v21 = vmov 0.0  }
  0x20   :  { %244 = vmatpush.msra.mxu3 %v225_v2  ;;  %527 = vset.pattern.permute.xlu0 %v664_v20 }
  0x21   :  { %197 = vmatpush.msra.mxu2 %v169_v22  ;;  %324 = vmatpush.msrb.mxu1 %v301_v28  ;;  %v507_v22 = vsel %vm388_vm6, 1.0, %v665_v21  ;;  %vm465_vm6 = vcmask 254976  }
  0x22   :  { %245 = vmatpush.msra.mxu3 %v224_v3 }
  0x23   :  { %198 = vmatpush.msra.mxu2 %v168_v23  ;;  %325 = vmatpush.msrb.mxu1 %v300_v29  ;;  %v508_v23 = vsel %vm389_vm7, 1.0, %v665_v21 }
  0x24   :  { %246 = vmatpush.msra.mxu3 %v223_v4  ;;  %v528_v24 = vpack.i.bf16 %v508_v23, %v507_v22 }
  0x25   :  { %326 = vmatpush.msrb.mxu1 %v299_v30  ;;  %371 = vmatpush.msrb.mxu2 %v356_v5 }
  0x26   :  { %497 = vmatmul.msk.f32.vlgmr.msrb.gmra.mxu0 %vm95_vm0, %v83_v9  ;;  %247 = vmatpush.msra.mxu3 %v222_v6  ;;  %v354_v9 = vld [vmem:[%s879_s9 + $0x28] sm:$0xff] }
  0x27   :  { %327 = vmatpush.msrb.mxu1 %v298_v31  ;;  %372 = vmatpush.msrb.mxu2 %v355_v7 }
  0x28   :  { %248 = vmatpush.msra.mxu3 %v221_v8  ;;  %529 = vperm.xlu0 %527, %v528_v24  }
  0x29   :  { %373 = vmatpush.msrb.mxu2 %v354_v9 }
  0x2a   :  { %249 = vmatpush.msra.mxu3 %v220_v10 }
  0x2b   :  { %374 = vmatpush.msrb.mxu2 %v353_v11 }
  0x2c   :  { %511 = vmatpush.msrb.mxu3 %v356_v5 }
  0x2d   :  { %375 = vmatpush.msrb.mxu2 %v352_v12 }
  0x2e   :  { %498 = vmatmul.msk.f32.gmra.mxu0 %vm95_vm0, %v84_v15  ;;  %512 = vmatpush.msrb.mxu3 %v355_v7  ;;  %v349_v15 = vld [vmem:[%s879_s9] sm:$0xff]  ;;  %s472_s9 = sshll.u32 %s666_s2, 4  ;;  %s473_s9 = int_to_ptr.vmem [resolvable:$true] %s472_s9 }
  0x2f   :  { %376 = vmatpush.msrb.mxu2 %v351_v13 }
  0x30   :  { %513 = vmatpush.msrb.mxu3 %v354_v9 }
  0x31   :  { %377 = vmatpush.msrb.mxu2 %v350_v14 }
  0x32   :  { %514 = vmatpush.msrb.mxu3 %v353_v11 }
  0x33   :  { %378 = vmatpush.msrb.mxu2 %v349_v15 }
  0x34   :  { %515 = vmatpush.msrb.mxu3 %v352_v12 }
  0x36   :  { %516 = vmatpush.msrb.mxu3 %v351_v13 }
  0x38   :  { %517 = vmatpush.msrb.mxu3 %v350_v14 }
  0x3a   :  { %518 = vmatpush.msrb.mxu3 %v349_v15 }
  0x93   :  { %v119_v32 = vpop.f32.mrf.mxu0  ;;  %v148_v33 = vpop.f32.mrf.mxu1 }
  0x94   :  { %v149_v34 = vadd.f32 %v148_v33, %v119_v32 }
  0x96   :  { %v156_v35 = vmul.f32 1.442695, %v149_v34  ;;  %vm154_vm1 = vcmp.gt.f32.partialorder %v149_v34, 0.0 }
  0x98   :  { %533 = vpow2.f32 %v156_v35 }
  0x9b   :  { %v122_v36 = vpop.f32.mrf.mxu0  ;;  %v151_v37 = vpop.f32.mrf.mxu1 }
  0x9c   :  { %v152_v38 = vadd.f32 %v151_v37, %v122_v36 }
  0x9e   :  { %v534_v39 = vpop.eup %533  ;;  %v158_v40 = vmul.f32 1.442695, %v152_v38  ;;  %vm155_vm3 = vcmp.gt.f32.partialorder %v152_v38, 0.0 }
  0x9f   :  { %v489_v41 = vadd.f32 -1.0, %v534_v39 }
  0xa0   :  { %535 = vpow2.f32 %v158_v40 }
  0xa1   :  { %v162_v42 = vmul.f32 1.6732632, %v489_v41 }
  0xa3   :  { %v278_v43 = vpop.f32.mrf.mxu0  ;;  %v164_v44 = vsel %vm154_vm1, %v149_v34, %v162_v42 }
  0xa4   :  { %v286_v45 = vmul.f32 1.442695, %v278_v43  ;;  %v166_v46 = vmul.f32 1.050701, %v164_v44  ;;  %vm284_vm4 = vcmp.gt.f32.partialorder %v278_v43, 0.0 }
  0xa6   :  { %v536_v47 = vpop.eup %535  ;;  %537 = vpow2.f32 %v286_v45  ;;  %491 = vmatmul.msk.f32.vlgmr.msra.gmra.mxu2 %vm176_vm2, %v166_v46 }
  0xa7   :  { %v490_v48 = vadd.f32 -1.0, %v536_v47 }
  0xa9   :  { %v163_v49 = vmul.f32 1.6732632, %v490_v48 }
  0xab   :  { %v281_v50 = vpop.f32.mrf.mxu0  ;;  %v165_v51 = vsel %vm155_vm3, %v152_v38, %v163_v49 }
  0xac   :  { %v538_v52 = vpop.eup %537  ;;  %v288_v53 = vmul.f32 1.442695, %v281_v50  ;;  %v167_v54 = vmul.f32 1.050701, %v165_v51  ;;  %vm285_vm5 = vcmp.gt.f32.partialorder %v281_v50, 0.0 }
  0xad   :  { %v499_v55 = vadd.f32 -1.0, %v538_v52 }
  0xae   :  { %539 = vpow2.f32 %v288_v53  ;;  %492 = vmatmul.msk.f32.gmra.mxu2 %vm176_vm2, %v167_v54 }
  0xaf   :  { %v292_v56 = vmul.f32 1.6732632, %v499_v55 }
  0xb1   :  { %v294_v57 = vsel %vm284_vm4, %v278_v43, %v292_v56 }
  0xb2   :  { %v296_v58 = vmul.f32 1.050701, %v294_v57 }
  0xb4   :  { %v540_v59 = vpop.eup %539  ;;  %501 = vmatmul.msk.f32.vlgmr.msrb.gmra.mxu1 %vm176_vm2, %v296_v58 }
  0xb5   :  { %v500_v60 = vadd.f32 -1.0, %v540_v59 }
  0xb7   :  { %v293_v61 = vmul.f32 1.6732632, %v500_v60 }
  0xb9   :  { %v295_v62 = vsel %vm285_vm5, %v281_v50, %v293_v61  ;;  %vm462_vm5 = vcmask 1041409  }
  0xba   :  { %v297_v63 = vmul.f32 1.050701, %v295_v62  ;;  %v530_v62 = vpop.permute.xlu0 %529 }
  0xbb   :  { %v531_v2 = vunpack.i.l.bf16 %v530_v62 }
  0xbc   :  { %502 = vmatmul.msk.f32.gmra.mxu1 %vm176_vm2, %v297_v63 }
 0x129   :  { %v200_v16 = vpop.f32.mrf.mxu2 }
 0x12a   :  { %v208_v17 = vmul.f32 1.442695, %v200_v16  ;;  %vm206_vm8 = vcmp.gt.f32.partialorder %v200_v16, 0.0 }
 0x12c   :  { %541 = vpow2.f32 %v208_v17 }
 0x131   :  { %v203_v25 = vpop.f32.mrf.mxu2  ;;  %v329_v26 = vpop.f32.mrf.mxu1 }
 0x132   :  { %v542_v27 = vpop.eup %541  ;;  %v210_v28 = vmul.f32 1.442695, %v203_v25  ;;  %v337_v29 = vmul.f32 1.442695, %v329_v26  ;;  %vm207_vm9 = vcmp.gt.f32.partialorder %v203_v25, 0.0  ;;  %vm335_vm10 = vcmp.gt.f32.partialorder %v329_v26, 0.0 }
 0x133   :  { %v493_v30 = vadd.f32 -1.0, %v542_v27 }
 0x134   :  { %543 = vpow2.f32 %v210_v28 }
 0x135   :  { %v214_v31 = vmul.f32 1.6732632, %v493_v30  ;;  %545 = vpow2.f32 %v337_v29 }
 0x137   :  { %v216_v32 = vsel %vm206_vm8, %v200_v16, %v214_v31  ;;  %v532_v16 = vunpack.i.h.bf16 %v530_v62 }
 0x138   :  { %v218_v33 = vmul.f32 1.050701, %v216_v32 }
 0x139   :  { %v332_v34 = vpop.f32.mrf.mxu1 }
 0x13a   :  { %v544_v35 = vpop.eup %543  ;;  %v339_v36 = vmul.f32 1.442695, %v332_v34  ;;  %495 = vmatmul.msk.f32.vlgmr.msra.gmra.mxu3 %vm176_vm2, %v218_v33  ;;  %vm336_vm11 = vcmp.gt.f32.partialorder %v332_v34, 0.0 }
 0x13b   :  { %v546_v37 = vpop.eup %545  ;;  %v494_v38 = vadd.f32 -1.0, %v544_v35 }
 0x13c   :  { %v503_v39 = vadd.f32 -1.0, %v546_v37  ;;  %547 = vpow2.f32 %v339_v36 }
 0x13d   :  { %v215_v40 = vmul.f32 1.6732632, %v494_v38 }
 0x13e   :  { %v343_v41 = vmul.f32 1.6732632, %v503_v39 }
 0x13f   :  { %v217_v42 = vsel %vm207_vm9, %v203_v25, %v215_v40 }
 0x140   :  { %v219_v43 = vmul.f32 1.050701, %v217_v42  ;;  %v345_v44 = vsel %vm335_vm10, %v329_v26, %v343_v41 }
 0x141   :  { %v347_v45 = vmul.f32 1.050701, %v345_v44 }
 0x142   :  { %v548_v46 = vpop.eup %547  ;;  %496 = vmatmul.msk.f32.gmra.mxu3 %vm176_vm2, %v219_v43 }
 0x143   :  { %v504_v47 = vadd.f32 -1.0, %v548_v46  ;;  %505 = vmatmul.msk.f32.vlgmr.msrb.gmra.mxu2 %vm176_vm2, %v347_v45 }
 0x145   :  { %v344_v48 = vmul.f32 1.6732632, %v504_v47 }
 0x147   :  { %v346_v49 = vsel %vm336_vm11, %v332_v34, %v344_v48 }
 0x148   :  { %v348_v50 = vmul.f32 1.050701, %v346_v49 }
 0x14a   :  { %506 = vmatmul.msk.f32.vlgmr.msrb.gmra.mxu3 %vm176_vm2, %v348_v50 }
 0x1bd   :  { %v251_v51 = vpop.f32.mrf.mxu3 }
 0x1be   :  { %v509_v52 = vmul.f32 -1.442695, %v251_v51 }
 0x1c0   :  { %549 = vpow2.f32 %v509_v52 }
 0x1c5   :  { %v254_v53 = vpop.f32.mrf.mxu3 }
 0x1c6   :  { %v550_v54 = vpop.eup %549  ;;  %v510_v55 = vmul.f32 -1.442695, %v254_v53  ;;  %v380_v11 = vpop.f32.mrf.mxu2 }
 0x1c7   :  { %v400_v56 = vadd.f32 1.0, %v550_v54 }
 0x1c8   :  { %551 = vpow2.f32 %v510_v55 }
 0x1c9   :  { %553 = vrcp.f32 %v400_v56  ;;  %v413_v63 = vand.u32 2147483648, %v400_v56  ;;  %v411_v1 = vand.u32 2147483647, %v400_v56  ;;  %vm407_vm13 = vweird.f32 %v400_v56 }
 0x1cb   :  { %v414_v5 = vor.u32 1.1754944e-38, %v413_v63  ;;  %vm412_vm15 = vcmp.eq.f32.partialorder %v411_v1, 8.507059e+37 }
 0x1cd   :  { %v383_v25 = vpop.f32.mrf.mxu3 }
 0x1ce   :  { %v552_v57 = vpop.eup %551 }
 0x1cf   :  { %v554_v58 = vpop.eup %553  ;;  %v401_v59 = vadd.f32 1.0, %v552_v57 }
 0x1d0   :  { %v403_v60 = vmul.f32 %v554_v58, %v400_v56  ;;  %vm408_vm12 = vweird.f32 %v554_v58 }
 0x1d1   :  { %555 = vrcp.f32 %v401_v59  ;;  %vm409_vm14 = vmor %vm407_vm13, %vm408_vm12  ;;  %v428_v12 = vand.u32 2147483648, %v401_v59  ;;  %v426_v14 = vand.u32 2147483647, %v401_v59  ;;  %vm422_vm2 = vweird.f32 %v401_v59 }
 0x1d2   :  { %v404_v61 = vsub.f32 1.0, %v403_v60 }
 0x1d3   :  { %v429_v19 = vor.u32 1.1754944e-38, %v428_v12  ;;  %vm427_vm4 = vcmp.eq.f32.partialorder %v426_v14, 8.507059e+37 }
 0x1d4   :  { %v405_v0 = vmul.f32 %v554_v58, %v404_v61 }
 0x1d6   :  { %v406_v3 = vadd.f32 %v554_v58, %v405_v0 }
 0x1d7   :  { %v556_v4 = vpop.eup %555 }
 0x1d8   :  { %v410_v6 = vsel %vm409_vm14, %v554_v58, %v406_v3  ;;  %v418_v7 = vmul.f32 %v556_v4, %v401_v59  ;;  %vm423_vm1 = vweird.f32 %v556_v4 }
 0x1d9   :  { %v415_v8 = vsel %vm412_vm15, %v414_v5, %v410_v6  ;;  %vm424_vm3 = vmor %vm422_vm2, %vm423_vm1 }
 0x1da   :  { %v419_v9 = vsub.f32 1.0, %v418_v7  ;;  %v442_v10 = vmul.f32 %v531_v2, %v415_v8 }
 0x1dc   :  { %v420_v13 = vmul.f32 %v556_v4, %v419_v9  ;;  %v444_v15 = vmul.f32 %v442_v10, %v380_v11 }
 0x1de   :  { %v421_v17 = vadd.f32 %v556_v4, %v420_v13  ;;  %v446_v18 = vsel %vm95_vm0, %v444_v15, 0.0 }
 0x1df   :  { %v447_v20 = vrot.slane %v446_v18, 4 }
 0x1e0   :  { %v425_v21 = vsel %vm424_vm3, %v556_v4, %v421_v17 }
 0x1e1   :  { %v430_v22 = vsel %vm427_vm4, %v429_v19, %v425_v21  ;;  %v448_v23 = vadd.f32 %v447_v20, %v446_v18 }
 0x1e2   :  { %v443_v24 = vmul.f32 %v532_v16, %v430_v22 }
 0x1e3   :  { %v449_v27 = vrot.slane %v448_v23, 2 }
 0x1e4   :  { %v445_v26 = vmul.f32 %v443_v24, %v383_v25 }
 0x1e5   :  { %v450_v30 = vadd.f32 %v449_v27, %v448_v23 }
 0x1e6   :  { %v453_v28 = vsel %vm95_vm0, %v445_v26, 0.0 }
 0x1e7   :  { %v454_v29 = vrot.slane %v453_v28, 4  ;;  %v451_v33 = vrot.slane %v450_v30, 1 }
 0x1e9   :  { %v455_v31 = vadd.f32 %v454_v29, %v453_v28  ;;  %v452_v36 = vadd.f32 %v451_v33, %v450_v30 }
 0x1eb   :  { %v456_v32 = vrot.slane %v455_v31, 2 }
 0x1ed   :  { %v457_v34 = vadd.f32 %v456_v32, %v455_v31 }
 0x1ef   :  { %v458_v35 = vrot.slane %v457_v34, 1 }
 0x1f1   :  { %v459_v37 = vadd.f32 %v458_v35, %v457_v34 }
 0x1f3   :  { %v463_v38 = vsel %vm462_vm5, %v459_v37, %v452_v36 }
 0x1f4   :  { %466 = vst.msk [vmem:[#allocation8] sm:$0x3] %vm465_vm6, %v463_v38 }
 0x1f5   :  { %477 = dma.vmem_to_hbm [thread:$0]  %s473_s9, 32, %s475_s7, [#allocation4]  }
 0x1f6   :  { %657 = dma.done.wait [#allocation4], 32  }
 0x1f7   :  { %658 = vsyncadd [#allocation4], 4294967264 }
 0x1f8   :  { %482 = vsyncpa [#allocation3], 1 }
 0x1f9   :  { %483 = vsyncpa [#allocation6], 1 }
 0x1fa   :  { %484 = vsyncpa [#allocation4], 1 }

</bundles_post_ra>
